<compile_context>
chip_gen: v7x
topology: tpu7x:2x2x1
jax: 0.10.0
libtpu: 0.0.40
codegen_flags: <defaults>
</compile_context>

<pallas_src>
import functools

import jax
import jax.numpy as jnp
from jax import lax
from jax.experimental import pallas as pl
from jax.experimental.pallas import tpu as pltpu

EPS = 1e-5                                # GroupNorm default eps
_TARGET_BLOCK_BYTES = 2 * 1024 * 1024     # ~1-4 MiB blocks amortize the ~0.35us/step


def _vmem_limit_bytes():
    """Explicit scoped-VMEM limit, sized per TPU generation."""
    try:
        cap = pltpu.get_tpu_info().vmem_capacity_bytes  # 128 MiB v5e/v6e, 64 MiB v7x
    except Exception:  # best effort; assume the smallest generation (v7x)
        cap = 64 * 1024 * 1024
    return int(min(cap - 8 * 1024 * 1024, 100 * 1024 * 1024))


def _largest_divisor_leq(n, cap):
    """Largest divisor of n that is <= cap (exact tiling: no ragged last block)."""
    cap = int(max(1, min(cap, n)))
    for d in range(cap, 0, -1):
        if n % d == 0:
            return d
    return 1


# ---------------------------------------------------------------------------
# Fused kernel: per grid step, a block of TN samples.
# x_ref   : (TN, Cin, L)        input block
# w_ref   : (Cout, K*Cin) bf16  conv weights, `scale` pre-folded, im2col row order
# b_ref   : (Cout, 1)    f32    conv bias column
# aff_ref : (1, 2*Cout, TN) f32 [gamma; beta] for this block (channels on sublanes)
# o_ref   : (TN, Cout, Lout)    output block
# ---------------------------------------------------------------------------
def _general_conv_kernel(x_ref, w_ref, b_ref, aff_ref, o_ref, *,
                         tn, k_size, pad, l_out, c_out, act_alpha):
    c_in = x_ref.shape[1]
    inv_count = 1.0 / float(c_out * l_out)

    # Loop-invariant values hoisted once per grid step (JAX does not CSE broadcasts).
    w = w_ref[...]                                    # (Cout, K*Cin) bf16
    b_col = b_ref[...].astype(jnp.float32)            # (Cout, 1)
    aff = aff_ref[0].astype(jnp.float32)              # (2*Cout, TN)
    gamma_all = aff[:c_out, :]                        # (Cout, TN)
    beta_all = aff[c_out:, :]                         # (Cout, TN)
    lane = lax.broadcasted_iota(jnp.int32, (1, tn), 1)
    zpad = jnp.zeros((c_in, pad), jnp.float32) if pad else None

    # Non-unrolled loop over the samples of this block: one sample's working set
    # (im2col stack + f32 accumulator) is live at a time -> no vreg spills, and the
    # per-sample matmul already has a K*Cin-deep contraction across L_out lanes.
    @pl.loop(0, tn)
    def _(i):
        x = x_ref[i].astype(jnp.float32)              # (Cin, L)
        if pad:
            x = jnp.concatenate([zpad, x, zpad], axis=1)   # in-kernel halo (no HBM pad)

        # im2col: K shifted views stacked on the contraction axis -> one deep bf16 dot.
        s = jnp.concatenate([x[:, t:t + l_out] for t in range(k_size)], axis=0)
        h = jnp.dot(w, s.astype(w.dtype), preferred_element_type=jnp.float32)
        h = h + b_col                                  # (Cout, Lout) f32

        # GroupNorm(1, C): per-sample mean / biased variance, one pass (sum, sumsq).
        sm = jnp.sum(jnp.sum(h, axis=1, keepdims=True), axis=0, keepdims=True)
        ss = jnp.sum(jnp.sum(h * h, axis=1, keepdims=True), axis=0, keepdims=True)
        mean = sm * inv_count
        var = jnp.maximum(ss * inv_count - mean * mean, 0.0)   # clamp cancellation
        rstd = lax.rsqrt(var + EPS)

        # Per-sample gamma/beta column via a one-hot lane reduce: channels already
        # sit on sublanes, so the column broadcasts against h with no relayout.
        sel = (lane == i).astype(jnp.float32)          # (1, TN)
        g_col = jnp.sum(gamma_all * sel, axis=1, keepdims=True)   # (Cout, 1)
        bt_col = jnp.sum(beta_all * sel, axis=1, keepdims=True)   # (Cout, 1)

        # Fold normalization + conditional affine into scale/shift: 2 VPU ops/elem.
        scale = g_col * rstd
        shift = bt_col - mean * scale
        out = h * scale + shift

        if act_alpha == 0:
            out = jnp.maximum(out, 0.0)                            # ReLU
        elif act_alpha > 0:
            out = jnp.where(out >= 0, out, act_alpha * out)        # LeakyReLU
        # act_alpha < 0: GeneralConv adds no activation.

        o_ref[i] = out.astype(o_ref.dtype)


# ---------------------------------------------------------------------------
# Wrapper: GeneralConv.forward
# ---------------------------------------------------------------------------
def general_conv_forward(x, y, conv_weight, conv_bias, scale, embed_weight,
                         *, pad=None, act_alpha=0.0,
                         norm_weight=None, norm_bias=None):
    """Fused forward of GeneralConv(act_norm='layer', do=0, spectral=False).

    x            : (N, Cin, L)
    y            : (N,) int class ids, or None (num_classes == 0 path)
    conv_weight  : (Cout, Cin, K)  (already divided by `scale`, as EqualizedConv1d does)
    conv_bias    : (Cout,)
    scale        : EqualizedConv1d scale (folded into the weights here)
    embed_weight : (num_classes, 2*Cout) or None
    norm_weight/norm_bias : optional (Cout,) affine of the unconditional GroupNorm
    """
    n, c_in, l = x.shape
    c_out, c_in_w, k = conv_weight.shape
    assert c_in_w == c_in
    pad = (k - 1) // 2 if pad is None else int(pad)
    l_out = l + 2 * pad - k + 1
    assert l_out >= 1

    # EqualizedConv1d: conv(x*scale, W) == conv(x, W*scale).  Fold scale into the
    # weights (free, wrapper-side) and lay them out in im2col row order; bf16 cast
    # -> single-pass MXU matmul with f32 accumulation.
    w_eff = conv_weight.astype(jnp.float32) * jnp.float32(scale)
    w_flat = jnp.transpose(w_eff, (0, 2, 1)).reshape(c_out, k * c_in).astype(jnp.bfloat16)
    b_col = conv_bias.astype(jnp.float32).reshape(c_out, 1)

    # Per-sample gamma/beta, pre-gathered in the wrapper (trivial XLA gather).
    if y is not None and embed_weight is not None:
        emb = embed_weight[y].astype(jnp.float32)           # (N, 2*Cout)
        gamma = emb[:, :c_out]
        beta = emb[:, c_out:]
    else:
        # num_classes == 0: plain GroupNorm(1, C) with its own (trainable) affine.
        gw = jnp.ones((c_out,), jnp.float32) if norm_weight is None \
            else norm_weight.astype(jnp.float32)
        gb = jnp.zeros((c_out,), jnp.float32) if norm_bias is None \
            else norm_bias.astype(jnp.float32)
        gamma = jnp.broadcast_to(gw, (n, c_out))
        beta = jnp.broadcast_to(gb, (n, c_out))

    vmem_limit = _vmem_limit_bytes()

    # ---- tile-count selection: explicit VMEM accounting, ~2 MiB DMA blocks,
    #      and >=2 grid steps so v7x's two TensorCores both get work ------------
    itemsize = x.dtype.itemsize
    per_sample_block = (itemsize * c_in * l          # input block row
                        + itemsize * c_out * l_out   # output block row
                        + 4 * 2 * c_out)             # affine column (lanes shared)
    # In-kernel per-sample temporaries (do NOT scale with TN thanks to pl.loop):
    per_sample_temp = (4 * (c_in * (l + 2 * pad)     # padded x (f32)
                            + k * c_in * l_out       # im2col stack (f32)
                            + 3 * c_out * l_out)     # h, h*h, out (f32)
                       + 2 * k * c_in * l_out)       # im2col stack (bf16)
    fixed = (2 * c_out * k * c_in                    # weights (bf16)
             + 4 * c_out * 128                       # bias block (lane-padded)
             + 4 * 2 * c_out * 128)                  # affine block lane padding
    headroom = vmem_limit - per_sample_temp - 2 * fixed - (4 << 20)
    tn_cap = max(1, min(_TARGET_BLOCK_BYTES // max(per_sample_block, 1),
                        headroom // max(2 * per_sample_block, 1)))
    if n >= 2:
        tn_cap = min(tn_cap, n // 2)                 # keep >=2 grid steps (v7x megacore)
    tn = _largest_divisor_leq(n, tn_cap)
    nb = n // tn

    # Affine slab: (nb, 2*Cout, TN).  One dense block per grid step, channel axis on
    # sublanes (broadcast-ready against h), samples on lanes -> no 128x trailing-1
    # padding per sample and no in-kernel transpose.
    aff = jnp.concatenate([gamma, beta], axis=1)                    # (N, 2*Cout)
    aff = aff.reshape(nb, tn, 2 * c_out).transpose(0, 2, 1)         # (nb, 2*Cout, TN)

    kernel = functools.partial(
        _general_conv_kernel, tn=tn, k_size=k, pad=pad, l_out=l_out,
        c_out=c_out, act_alpha=float(act_alpha))

    return pl.pallas_call(
        kernel,
        out_shape=jax.ShapeDtypeStruct((n, c_out, l_out), x.dtype),
        grid_spec=pltpu.PrefetchScalarGridSpec(
            num_scalar_prefetch=0,
            grid=(nb,),
            in_specs=[
                pl.BlockSpec((tn, c_in, l), lambda i: (i, 0, 0)),
                pl.BlockSpec((c_out, k * c_in), lambda i: (0, 0)),
                pl.BlockSpec((c_out, 1), lambda i: (0, 0)),
                pl.BlockSpec((1, 2 * c_out, tn), lambda i: (i, 0, 0)),
            ],
            # Full (C, L) dims per block; keep L a multiple of 128 for production
            # shapes so stores stay unmasked.
            out_specs=pl.BlockSpec((tn, c_out, l_out), lambda i: (i, 0, 0)),
        ),
        compiler_params=pltpu.CompilerParams(
            dimension_semantics=("parallel",),
            vmem_limit_bytes=vmem_limit,
        ),
    )(x, w_flat, b_col, aff)


# ---------------------------------------------------------------------------
# Pure-JAX reference (matmul products match the kernel's bf16 single-pass MXU
# policy so the check isolates layout/indexing bugs at tight tolerance).
# ---------------------------------------------------------------------------
def _reference(x, y, conv_weight, conv_bias, scale, embed_weight, *, pad,
               act_alpha=0.0, norm_weight=None, norm_bias=None):
    c = conv_weight.shape[0]
    xb = x.astype(jnp.bfloat16)
    wb = (conv_weight.astype(jnp.float32) * jnp.float32(scale)).astype(jnp.bfloat16)
    h = lax.conv_general_dilated(
        xb, wb, window_strides=(1,), padding=[(pad, pad)],
        dimension_numbers=("NCH", "OIH", "NCH"),
        preferred_element_type=jnp.float32)
    h = h + conv_bias.reshape(1, -1, 1).astype(jnp.float32)
    mean = jnp.mean(h, axis=(1, 2), keepdims=True)
    var = jnp.mean((h - mean) ** 2, axis=(1, 2), keepdims=True)
    out = (h - mean) * lax.rsqrt(var + EPS)
    if y is not None and embed_weight is not None:
        emb = embed_weight[y].astype(jnp.float32)
        gamma = emb[:, :c].reshape(-1, c, 1)
        beta = emb[:, c:].reshape(-1, c, 1)
    else:
        gamma = (jnp.ones((c,), jnp.float32) if norm_weight is None
                 else norm_weight.astype(jnp.float32)).reshape(1, c, 1)
        beta = (jnp.zeros((c,), jnp.float32) if norm_bias is None
                else norm_bias.astype(jnp.float32)).reshape(1, c, 1)
    out = gamma * out + beta
    if act_alpha == 0:
        out = jnp.maximum(out, 0.0)
    elif act_alpha > 0:
        out = jnp.where(out >= 0, out, act_alpha * out)
    return out.astype(x.dtype)


if __name__ == "__main__":
    N, C_IN, C_OUT, L, K = 2, 4, 4, 16, 3
    NUM_CLASSES = 6
    PAD = (K - 1) // 2

    key = jax.random.PRNGKey(0)
    kx, kw, kb, kg, ky = jax.random.split(key, 5)

    x = jax.random.normal(kx, (N, C_IN, L), dtype=jnp.float32)

    # EqualizedConv1d init: kaiming-ish weight, scale = RMS(weight), weight /= scale.
    w_raw = jax.random.normal(kw, (C_OUT, C_IN, K), dtype=jnp.float32) / jnp.sqrt(C_IN * K)
    scale = float(jnp.sqrt(jnp.mean(w_raw ** 2)))
    conv_weight = w_raw / scale
    conv_bias = 0.1 * jax.random.normal(kb, (C_OUT,), dtype=jnp.float32)

    # Conditional embedding: gamma half ~ N(1, 0.02), beta half = 0.
    gamma_w = 1.0 + 0.02 * jax.random.normal(kg, (NUM_CLASSES, C_OUT), dtype=jnp.float32)
    beta_w = jnp.zeros((NUM_CLASSES, C_OUT), dtype=jnp.float32)
    embed_weight = jnp.concatenate([gamma_w, beta_w], axis=1)      # (classes, 2C)
    y = jax.random.randint(ky, (N,), 0, NUM_CLASSES, dtype=jnp.int32)

    out = jax.block_until_ready(
        general_conv_forward(x, y, conv_weight, conv_bias, scale, embed_weight,
                             pad=PAD, act_alpha=0.0))
    ref = _reference(x, y, conv_weight, conv_bias, scale, embed_weight,
                     pad=PAD, act_alpha=0.0)
    assert out.shape == (N, C_OUT, L)
    assert jnp.allclose(out, ref, atol=1e-3, rtol=1e-3), "conditional path mismatch"

    # Also exercise the unconditional (num_classes == 0 / y=None) path once.
    out_u = jax.block_until_ready(
        general_conv_forward(x, None, conv_weight, conv_bias, scale, None,
                             pad=PAD, act_alpha=0.0))
    ref_u = _reference(x, None, conv_weight, conv_bias, scale, None,
                       pad=PAD, act_alpha=0.0)
    assert jnp.allclose(out_u, ref_u, atol=1e-3, rtol=1e-3), "unconditional path mismatch"

    print("KERNEL_OK")
</pallas_src>

<mosaic_0001>
module attributes {stable_mosaic.version = 11 : i64} {
  func.func @_general_conv_kernel(%arg0: i32, %arg1: memref<1x4x16xf32, #tpu.memory_space<vmem>>, %arg2: memref<4x12xbf16, #tpu.memory_space<vmem>>, %arg3: memref<4x1xf32, #tpu.memory_space<vmem>>, %arg4: memref<1x8x1xf32, #tpu.memory_space<vmem>>, %arg5: memref<1x4x16xf32, #tpu.memory_space<vmem>>) attributes {dimension_semantics = [#tpu.dimension_semantics<parallel>], iteration_bounds = array<i64: 2>, scalar_prefetch = 0 : i64, scratch_operands = 0 : i64, tpu.core_type = #tpu.core_type<tc>, window_params = [{transform_indices = @transform_0, window_bounds = array<i64: 1, 4, 16>}, {pipeline_mode = #tpu.pipeline_mode<synchronous>, transform_indices = @transform_1, window_bounds = array<i64: 4, 12>}, {pipeline_mode = #tpu.pipeline_mode<synchronous>, transform_indices = @transform_2, window_bounds = array<i64: 4, 1>}, {transform_indices = @transform_3, window_bounds = array<i64: 1, 8, 1>}, {transform_indices = @transform_4, window_bounds = array<i64: 1, 4, 16>}]} {
    %c0 = arith.constant 0 : index
    %c0_0 = arith.constant 0 : index
    %0 = vector.load %arg2[%c0, %c0_0] : memref<4x12xbf16, #tpu.memory_space<vmem>>, vector<4x12xbf16>
    %c0_1 = arith.constant 0 : index
    %c0_2 = arith.constant 0 : index
    %1 = vector.load %arg3[%c0_1, %c0_2] : memref<4x1xf32, #tpu.memory_space<vmem>>, vector<4x1xf32>
    %c0_3 = arith.constant 0 : index
    %c0_4 = arith.constant 0 : index
    %c0_5 = arith.constant 0 : index
    %2 = vector.load %arg4[%c0_3, %c0_4, %c0_5] : memref<1x8x1xf32, #tpu.memory_space<vmem>>, vector<1x8x1xf32>
    %3 = vector.shape_cast %2 : vector<1x8x1xf32> to vector<8x1xf32>
    %4 = vector.extract_strided_slice %3 {offsets = [0, 0], sizes = [4, 1], strides = [1, 1]} : vector<8x1xf32> to vector<4x1xf32>
    %5 = vector.extract_strided_slice %3 {offsets = [4, 0], sizes = [4, 1], strides = [1, 1]} : vector<8x1xf32> to vector<4x1xf32>
    %6 = tpu.iota {dimensions = array<i32: 1>} : vector<1x1xi32>
    %cst = arith.constant 0.000000e+00 : f32
    %7 = vector.broadcast %cst : f32 to vector<4x1xf32>
    %c0_i32 = arith.constant 0 : i32
    %c1_i32 = arith.constant 1 : i32
    %8 = arith.muli %c0_i32, %c1_i32 : i32
    %c0_i32_6 = arith.constant 0 : i32
    %9 = arith.addi %c0_i32_6, %8 : i32
    %10 = arith.index_cast %9 : i32 to index
    %c0_7 = arith.constant 0 : index
    %c0_8 = arith.constant 0 : index
    %11 = vector.load %arg1[%10, %c0_7, %c0_8] : memref<1x4x16xf32, #tpu.memory_space<vmem>>, vector<1x4x16xf32>
    %12 = vector.shape_cast %11 : vector<1x4x16xf32> to vector<4x16xf32>
    %13 = tpu.concatenate %7, %12, %7 in 1 : vector<4x1xf32>, vector<4x16xf32>, vector<4x1xf32> -> vector<4x18xf32>
    %14 = vector.extract_strided_slice %13 {offsets = [0, 0], sizes = [4, 16], strides = [1, 1]} : vector<4x18xf32> to vector<4x16xf32>
    %15 = vector.extract_strided_slice %13 {offsets = [0, 1], sizes = [4, 16], strides = [1, 1]} : vector<4x18xf32> to vector<4x16xf32>
    %16 = vector.extract_strided_slice %13 {offsets = [0, 2], sizes = [4, 16], strides = [1, 1]} : vector<4x18xf32> to vector<4x16xf32>
    %17 = tpu.concatenate %14, %15, %16 in 0 : vector<4x16xf32>, vector<4x16xf32>, vector<4x16xf32> -> vector<12x16xf32>
    %18 = arith.truncf %17 : vector<12x16xf32> to vector<12x16xbf16>
    %cst_9 = arith.constant dense<0.000000e+00> : vector<4x16xf32>
    %19 = tpu.matmul %0, %18, %cst_9 {dimension_numbers = #tpu.dot_dimension_numbers<[1], [0], [0], [1], [0, 0, 1, 1], [], []>} : vector<4x12xbf16>, vector<12x16xbf16>, vector<4x16xf32> -> vector<4x16xf32>
    %20 = vector.broadcast %1 : vector<4x1xf32> to vector<4x16xf32>
    %21 = arith.addf %19, %20 : vector<4x16xf32>
    %cst_10 = arith.constant dense<0.000000e+00> : vector<4xf32>
    %22 = vector.multi_reduction <add>, %21, %cst_10 [1] : vector<4x16xf32> to vector<4xf32>
    %23 = vector.shape_cast %22 : vector<4xf32> to vector<4x1xf32>
    %cst_11 = arith.constant dense<0.000000e+00> : vector<1xf32>
    %24 = vector.multi_reduction <add>, %23, %cst_11 [0] : vector<4x1xf32> to vector<1xf32>
    %25 = vector.shape_cast %24 : vector<1xf32> to vector<1x1xf32>
    %26 = arith.mulf %21, %21 : vector<4x16xf32>
    %cst_12 = arith.constant dense<0.000000e+00> : vector<4xf32>
    %27 = vector.multi_reduction <add>, %26, %cst_12 [1] : vector<4x16xf32> to vector<4xf32>
    %28 = vector.shape_cast %27 : vector<4xf32> to vector<4x1xf32>
    %cst_13 = arith.constant dense<0.000000e+00> : vector<1xf32>
    %29 = vector.multi_reduction <add>, %28, %cst_13 [0] : vector<4x1xf32> to vector<1xf32>
    %30 = vector.shape_cast %29 : vector<1xf32> to vector<1x1xf32>
    %cst_14 = arith.constant 1.562500e-02 : f32
    %31 = vector.broadcast %cst_14 : f32 to vector<1x1xf32>
    %32 = arith.mulf %25, %31 : vector<1x1xf32>
    %cst_15 = arith.constant 1.562500e-02 : f32
    %33 = vector.broadcast %cst_15 : f32 to vector<1x1xf32>
    %34 = arith.mulf %30, %33 : vector<1x1xf32>
    %35 = arith.mulf %32, %32 : vector<1x1xf32>
    %36 = arith.subf %34, %35 : vector<1x1xf32>
    %cst_16 = arith.constant 0.000000e+00 : f32
    %37 = vector.broadcast %cst_16 : f32 to vector<1x1xf32>
    %38 = arith.maximumf %36, %37 : vector<1x1xf32>
    %cst_17 = arith.constant 9.99999974E-6 : f32
    %39 = vector.broadcast %cst_17 : f32 to vector<1x1xf32>
    %40 = arith.addf %38, %39 : vector<1x1xf32>
    %41 = math.rsqrt %40 : vector<1x1xf32>
    %42 = vector.broadcast %9 : i32 to vector<1x1xi32>
    %43 = arith.cmpi eq, %6, %42 : vector<1x1xi32>
    %44 = arith.extui %43 : vector<1x1xi1> to vector<1x1xi32>
    %45 = arith.sitofp %44 : vector<1x1xi32> to vector<1x1xf32>
    %46 = vector.broadcast %45 : vector<1x1xf32> to vector<4x1xf32>
    %47 = arith.mulf %4, %46 : vector<4x1xf32>
    %cst_18 = arith.constant dense<0.000000e+00> : vector<4xf32>
    %48 = vector.multi_reduction <add>, %47, %cst_18 [1] : vector<4x1xf32> to vector<4xf32>
    %49 = vector.shape_cast %48 : vector<4xf32> to vector<4x1xf32>
    %50 = vector.broadcast %45 : vector<1x1xf32> to vector<4x1xf32>
    %51 = arith.mulf %5, %50 : vector<4x1xf32>
    %cst_19 = arith.constant dense<0.000000e+00> : vector<4xf32>
    %52 = vector.multi_reduction <add>, %51, %cst_19 [1] : vector<4x1xf32> to vector<4xf32>
    %53 = vector.shape_cast %52 : vector<4xf32> to vector<4x1xf32>
    %54 = vector.broadcast %41 : vector<1x1xf32> to vector<4x1xf32>
    %55 = arith.mulf %49, %54 : vector<4x1xf32>
    %56 = vector.broadcast %32 : vector<1x1xf32> to vector<4x1xf32>
    %57 = arith.mulf %56, %55 : vector<4x1xf32>
    %58 = arith.subf %53, %57 : vector<4x1xf32>
    %59 = vector.broadcast %55 : vector<4x1xf32> to vector<4x16xf32>
    %60 = arith.mulf %21, %59 : vector<4x16xf32>
    %61 = vector.broadcast %58 : vector<4x1xf32> to vector<4x16xf32>
    %62 = arith.addf %60, %61 : vector<4x16xf32>
    %cst_20 = arith.constant 0.000000e+00 : f32
    %63 = vector.broadcast %cst_20 : f32 to vector<4x16xf32>
    %64 = arith.maximumf %62, %63 : vector<4x16xf32>
    %65 = arith.index_cast %9 : i32 to index
    %c0_21 = arith.constant 0 : index
    %c0_22 = arith.constant 0 : index
    %66 = vector.load %arg5[%65, %c0_21, %c0_22] : memref<1x4x16xf32, #tpu.memory_space<vmem>>, vector<1x4x16xf32>
    %67 = vector.shape_cast %66 : vector<1x4x16xf32> to vector<4x16xf32>
    %68 = vector.shape_cast %64 : vector<4x16xf32> to vector<1x4x16xf32>
    tpu.vector_store %arg5[%65, %c0_21, %c0_22], %68 {strides = array<i32>} : memref<1x4x16xf32, #tpu.memory_space<vmem>>, vector<1x4x16xf32>,
    %c1_i32_23 = arith.constant 1 : i32
    return
  }
  func.func @transform_0(%arg0: i32) -> (i32, i32, i32) {
    %c0_i32 = arith.constant 0 : i32
    %c0_i32_0 = arith.constant 0 : i32
    %c0_i32_1 = arith.constant 0 : i32
    return %arg0, %c0_i32, %c0_i32_0 : i32, i32, i32
  }
  func.func @transform_1(%arg0: i32) -> (i32, i32) {
    %c0_i32 = arith.constant 0 : i32
    %c0_i32_0 = arith.constant 0 : i32
    %c0_i32_1 = arith.constant 0 : i32
    return %c0_i32, %c0_i32_0 : i32, i32
  }
  func.func @transform_2(%arg0: i32) -> (i32, i32) {
    %c0_i32 = arith.constant 0 : i32
    %c0_i32_0 = arith.constant 0 : i32
    %c0_i32_1 = arith.constant 0 : i32
    return %c0_i32, %c0_i32_0 : i32, i32
  }
  func.func @transform_3(%arg0: i32) -> (i32, i32, i32) {
    %c0_i32 = arith.constant 0 : i32
    %c0_i32_0 = arith.constant 0 : i32
    %c0_i32_1 = arith.constant 0 : i32
    return %arg0, %c0_i32, %c0_i32_0 : i32, i32, i32
  }
  func.func @transform_4(%arg0: i32) -> (i32, i32, i32) {
    %c0_i32 = arith.constant 0 : i32
    %c0_i32_0 = arith.constant 0 : i32
    %c0_i32_1 = arith.constant 0 : i32
    return %arg0, %c0_i32, %c0_i32_0 : i32, i32, i32
  }
}

</mosaic_0001>

<bundles_post_ra>
// kernel: tpu_custom_call.1
= control target key start
LH: loop header
LB: loop body
LE: loop exit
PB: predicated region body
PF: predicated region fallthrough
CT: control target
= control target key end

     0   :  { %9 = vsyncpa [#allocation3], 0  ;;  %s714_s0 = inlined_call_operand.vmem [shape: f32[2,4,16], index: 0, kind: input, shape index: {}]   ;;  %s715_s1 = inlined_call_operand.vmem [shape: bf16[4,12], index: 1, kind: input, shape index: {}]   ;;  %s716_s2 = inlined_call_operand.vmem [shape: f32[4,1], index: 2, kind: input, shape index: {}]   ;;  %s717_s3 = inlined_call_operand.vmem [shape: f32[2,8,1], index: 3, kind: input, shape index: {}]   ;;  %s718_s4 = inlined_call_operand.hbm [shape: f32[2,4,16], index: 4, kind: output, shape index: {}]  }
   0x1   :  { %11 = vsyncpa [#allocation3 + $0x1], 0  ;;  %s595_s15 = smov 0   ;;  %s597_s16 = smov 0  }
   0x2   :  { %s599_s17 = smov 0   ;;  %s601_s18 = smov 0  }
   0x3 LB: > { %s616_s19 = sadd.s32 4294967295, %s561_s18   ;;  %s429_s20 = sadd.s32 4294967294, %s561_s18   ;;  %s561_s18 = sphi %s601_s18, %s724_s18   ;;  %s557_s17 = sphi %s599_s17, %s723_s17   ;;  %s553_s16 = sphi %s597_s16, %s722_s16   ;;  %s549_s15 = sphi %s595_s15, %s721_s15  }
   0x4   : > { %s620_s21 = sadd.s32 1, %s561_s18   ;;  %s118_s22 = sadd.s32 1, %s557_s17 }
   0x5   : > { %s115_s23 = ssub.s32 %s561_s18, %s620_s21  ;;  %p128_p0 = scmp.ne.s32.totalorder %s557_s17, %s553_s16 }
   0x6   : > { %p116_p1 = scmp.eq.s32.totalorder %s115_s23, 0  ;;  %p129_p2 = scmp.eq.s32.totalorder %s616_s19, 1 }
   0x7   : > { %p134_p3 = scmp.ne.s32.totalorder %s553_s16, %s549_s15  ;;  %p135_p4 = scmp.eq.s32.totalorder %s429_s20, 1 }
   0x8   : > { %s631_s24 = scalar_select %p116_p1, %s557_s17, %s118_s22  }
   0x9   : > { %p633_p5 = por %p129_p2, %p128_p0  ;;  %p637_p6 = por %p135_p4, %p134_p3 }
   0xa   : > { %p432_p7 = scmp.ge.s32.totalorder %s561_s18, 1  ;;  %p173_p8 = scmp.lt.s32.totalorder %s561_s18, 3 }
   0xc   : > { %p174_p9 = pnand %p432_p7, %p173_p8 }
   0xd   : > { %p202_p10 = scmp.lt.s32.totalorder (!%p174_p9), %s616_s19, 1  ;;  %s563_s6 = smov (!%p174_p9), 1   ;;  %v214_v1 = vlaneseq (!%p174_p9)  ;;  %v564_v2 = vmov (!%p174_p9), 0.0   ;;  %vm565_vm1 = vmmov (!%p174_p9), 0   ;;  %vm221_vm2 = vcmask (!%p174_p9), 7168  }
   0xe   : > { %177 = sbr.rel (%p174_p9) target bundleno = 814 (0x32e), region = 36  ;;  %444 = vmatprep.subr.bf16.mxu0 (!%p174_p9), %v564_v2  ;;  %446 = vmatprep.mubr.msk.bf16.mxu0 (!%p174_p9), %vm565_vm1, %v564_v2  ;;  %vm223_vm3 = vcmask (!%p174_p9), 138240   ;;  %v566_v8 = vmov (!%p174_p9), 0   ;;  %s567_s11 = smov (!%p174_p9), 126   ;;  %v212_v12 = vld [vmem:[%s716_s2] sm:$0xf] (!%p174_p9) }
   0xf   : > { %v215_v3 = vand.u32 (!%p174_p9), 127, %v214_v1  ;;  %495 = vset.pattern.permute.xlu1 (!%p174_p9), %v566_v8  ;;  %496 = vset.pattern.permute.xlu0 (!%p174_p9), %v566_v8  ;;  %s568_s14 = smov (!%p174_p9), 127   ;;  %vm233_vm4 = vcmask (!%p174_p9), 1043456   ;;  %vm245_vm5 = vcmask (!%p174_p9), 1045504   ;;  %v211_v18 = vld [vmem:[%s715_s1] sm:$0x3] (!%p174_p9) }
  0x10   : > { %vm241_vm6 = vcmask (!%p174_p9), 97280   ;;  %vm289_vm7 = vcmask (!%p174_p9), 125952   ;;  %s199_s23 = sand.u32 (!%p174_p9), 1, %s553_s16  }
  0x11   : > { %vm318_vm0 = vcmp.eq.s32.totalorder (!%p174_p9), %v215_v3, 0  ;;  %s345_s8 = scalar_lea.sflag (!%p174_p9), [#allocation3], %s199_s23 }
  0x12   : > { %v437_v5 = vsel (!%p174_p9), %vm318_vm0, 1.0, %v564_v2 }
  0x15   : > { %s203_s27 = scalar_select %p202_p10, %s616_s19, 1 }
  0x17   : > { %s434_s28 = sshll.u32 %s203_s27, 2  ;;  %s435_s7 = sshll.u32 %s203_s27, 3 }
  0x18   : > { %s205_s5 = scalar_lea.vmem %s714_s0, %s434_s28  ;;  %s209_s10 = scalar_lea.vmem %s717_s3, %s435_s7 }
  0x19   : > { %v216_v0 = vld [vmem:[%s205_s5] sm:$0xf]  ;;  %s433_s27 = sshll.u32 %s199_s23, 2  ;;  %s439_s28 = sshll.u32 %s616_s19, 6 }
  0x1a   : > { %218 = vrot.lane.b32.xlu0 %v216_v0, %s563_s6  ;;  %v213_v4 = vld [vmem:[%s209_s10] sm:$0xff]  ;;  %s201_s29 = scalar_lea.vmem [#allocation2], %s433_s27  ;;  %s671_s7 = scalar_lea.hbm %s718_s4, %s439_s28 }
  0x1b   : > { %v651_v6 = vmul.f32 %v437_v5, %v213_v4  ;;  %s358_s30 = sshll.u32 %s201_s29, 4  ;;  %s569_s19 = smov [#allocation2]   ;;  %s673_s30 = int_to_ptr.vmem [resolvable:$true] %s358_s30 }
  0x1c   : > { %s499_s9 = scalar_lea.vmem %s673_s30, 64  ;;  %s503_s10 = sshll.u32 %s569_s19, 4  ;;  %s504_s10 = int_to_ptr.vmem [resolvable:$false] %s503_s10 }
  0x1d   : > { %p500_p11 = scmp.ne.s32.totalorder %s673_s30, %s499_s9  ;;  %p506_p0 = scmp.lt.s32.totalorder %s673_s30, %s504_s10 }
  0x1f   : > { %p501_p12 = pnand %p500_p11, %p633_p5 }
  0x21   : > { %p502_p13 = pneg %p501_p12 }
  0x8c   : > { %v219_v7 = vpop.permute.xlu0 %218 }
  0x8d   : > { %v222_v9 = vsel %vm221_vm2, 0.0, %v219_v7 }
  0x8e   : > { %v224_v10 = vsel %vm223_vm3, %v222_v9, 0.0 }
  0x8f   : > { %v226_v11 = vrot.slane %v224_v10, 4  ;;  %230 = vrot.lane.b32.xlu1 %v224_v10, %s567_s11  ;;  %s505_s11 = scalar_lea.vmem %s504_s10, 128 }
  0x90   : > { %p507_p1 = scmp.lt.s32.totalorder %s505_s11, %s499_s9 }
  0x91   : > { %227 = vrot.lane.b32.xlu0 %v226_v11, %s568_s14 }
  0x92   : > { %p508_p2 = por %p507_p1, %p506_p0 }
  0x93   : > { %238 = vperm.xlu1 %495, %v212_v12  }
  0x94   : > { %p509_p3 = pnand %p508_p2, %p502_p13 }
 0x101   : > { %v231_v14 = vpop.permute.xlu1 %230 }
 0x103   : > { %v228_v13 = vpop.permute.xlu0 %227 }
 0x104   : > { %v234_v15 = vsel %vm233_vm4, %v224_v10, %v228_v13 }
 0x105   : > { %v235_v16 = vpack.c.bf16 %v231_v14, %v234_v15 }
 0x107   : > { %v247_v17 = vsel %vm245_vm5, %v235_v16, 0 }
 0x108   : > { %445 = vmatpush3.bf16.msra.mxu0 %v247_v17 }
 0x10b   : > { %447 = vmatmul.mubr.msk.bf16.vlgmr.msra.gmra.mrb[0].mxu0 %vm241_vm6, %v211_v18 }
 0x112   : > { %v239_v19 = vpop.permute.xlu1 %238 }
 0x1de   : > { %v283_v20 = vpop.f32.mrb[0].mxu0 }
 0x1df   : > { %v284_v21 = vadd.f32 %v283_v20, %v239_v19  ;;  %v448_v22 = vpop.f32.mrb[1].mxu0 }
 0x1e0   : > { %v286_v23 = vpop.f32.mrb[2].mxu0 }
 0x1e1   : > { %v449_v24 = vpop.f32.mrb[3].mxu0  ;;  %v290_v25 = vsel %vm289_vm7, %v284_v21, 0.0  ;;  %v300_v26 = vmul.f32 %v284_v21, %v284_v21 }
 0x1e2   : > { %291 = vadd.xlane.f32.xlu0 %v290_v25 }
 0x1e3   : > { %v301_v27 = vsel %vm289_vm7, %v300_v26, 0.0 }
 0x1e4   : > { %302 = vadd.xlane.f32.xlu1 %v301_v27 }
 0x26f   : > { %v292_v28 = vpop.xlane.xlu0 %291 }
 0x270   : > { %v293_v29 = vsel %vm233_vm4, %v292_v28, 0.0 }
 0x271   : > { %v294_v30 = vrot.slane %v293_v29, 4  ;;  %v303_v31 = vpop.xlane.xlu1 %302 }
 0x272   : > { %v304_v32 = vsel %vm233_vm4, %v303_v31, 0.0 }
 0x273   : > { %v295_v33 = vadd.f32 %v294_v30, %v293_v29  ;;  %v305_v34 = vrot.slane %v304_v32, 4 }
 0x275   : > { %v296_v35 = vrot.slane %v295_v33, 2  ;;  %v306_v36 = vadd.f32 %v305_v34, %v304_v32 }
 0x277   : > { %v297_v37 = vadd.f32 %v296_v35, %v295_v33  ;;  %v307_v38 = vrot.slane %v306_v36, 2 }
 0x279   : > { %v298_v39 = vrot.slane %v297_v37, 1  ;;  %v308_v40 = vadd.f32 %v307_v38, %v306_v36 }
 0x27b   : > { %v299_v41 = vadd.f32 %v298_v39, %v297_v37  ;;  %v309_v42 = vrot.slane %v308_v40, 1 }
 0x27d   : > { %v311_v43 = vmul.f32 0.015625, %v299_v41  ;;  %v310_v44 = vadd.f32 %v309_v42, %v308_v40 }
 0x27f   : > { %v313_v45 = vmul.f32 %v311_v43, %v311_v43  ;;  %v312_v46 = vmul.f32 0.015625, %v310_v44 }
 0x281   : > { %v314_v47 = vsub.f32 %v312_v46, %v313_v45 }
 0x283   : > { %v315_v48 = vmax.f32 %v314_v47, 0.0 }
 0x285   : > { %v316_v49 = vadd.f32 1e-05, %v315_v48 }
 0x287   : > { %497 = vrsqrt.f32 %v316_v49 }
 0x291   : > { %v498_v50 = vpop.eup %497 }
 0x292   : > { %v323_v51 = vmul.f32 %v498_v50, %v651_v6 }
 0x294   : > { %331 = vperm.xlu0 %496, %v323_v51   ;;  %v324_v52 = vmul.f32 %v323_v51, %v311_v43 }
 0x296   : > { %v326_v53 = vrot.slane %v324_v52, 4 }
 0x298   : > { %v328_v54 = vsub.f32 %v651_v6, %v326_v53 }
 0x29a   : > { %337 = vperm.xlu1 %495, %v328_v54  }
 0x313   : > { %v332_v55 = vpop.permute.xlu0 %331 }
 0x314   : > { %v334_v57 = vmul.f32 %v332_v55, %v284_v21 }
 0x319   : > { %v338_v56 = vpop.permute.xlu1 %337 }
 0x31a   : > { %v339_v58 = vrot.slane %v338_v56, 4 }
 0x31c   : > { %v341_v59 = vadd.f32 %v339_v58, %v334_v57 }
 0x31e   : > { %v342_v60 = vmax.f32 %v341_v59, 0.0 }
 0x320   : > { %343 = vst.msk [vmem:[%s201_s29] sm:$0xf] %vm289_vm7, %v342_v60 }
 0x321   : > { %512 = shalt.err (!%p509_p3)
}
 0x322   : > { %s513_s12 = scalar_lea.hbm %s671_s7, 64  ;;  %s517_s20 = scalar_lea.hbm %s718_s4, 128 }
 0x323   : > { %p514_p4 = scmp.ne.s32.totalorder %s671_s7, %s513_s12  ;;  %p518_p9 = scmp.lt.u32.totalorder %s671_s7, %s718_s4 }
 0x324   : > { %p519_p10 = scmp.lt.u32.totalorder %s517_s20, %s513_s12  ;;  %p521_p12 = scmp.lt.u32.totalorder %s513_s12, %s671_s7 }
 0x325   : > { %p515_p7 = pnand %p514_p4, %p633_p5 }
 0x326   : > { %p520_p11 = por %p519_p10, %p518_p9 }
 0x327   : > { %p516_p8 = pneg %p515_p7 }
 0x328   : > { %p522_p13 = por %p521_p12, %p520_p11 }
 0x32a   : > { %p523_p0 = pnand %p522_p13, %p516_p8 }
 0x32c   : > { %526 = shalt.err (!%p523_p0)
}
 0x32d   : > { %450 = dma.vmem_to_hbm [thread:$0]  (%p633_p5), %s673_s30, 64, %s671_s7, %s345_s8  }
 0x32e PF: > { %p456_p1 = scmp.ge.s32.totalorder %s561_s18, 2  ;;  %s370_s27 = sand.u32 1, %s549_s15  }
 0x32f   : > { %s371_s28 = scalar_lea.sflag [#allocation3], %s370_s27 }
 0x330   : > { %p453_p2 = pnand %p456_p1, %p637_p6 }
 0x332   : > { %544 = dma.done.wait (!%p453_p2), %s371_s28, 64  }
 0x333   : > { %546 = vsyncadd (!%p453_p2), %s371_s28, 4294967232  ;;  %p14_p3 = scmp.ge.s32.totalorder %s620_s21, 4   ;;  %s721_s15 = smov %s553_s16 }
 0x334   : > { %s722_s16 = smov %s557_s17  ;;  %s723_s17 = smov %s631_s24 }
 0x335   : > { %s724_s18 = smov %s620_s21  ;;  %16 = sbr.rel (!%p14_p3) target bundleno = 3 (0x3), region = 74 }
 0x33c   :  { %376 = vsyncpa [#allocation3], 1 }
 0x33d   :  { %378 = vsyncpa [#allocation3 + $0x1], 1 }

</bundles_post_ra>
